<compile_context>
chip_gen: v7x
topology: tpu7x:2x2x1
jax: 0.10.0
libtpu: 0.0.40
codegen_flags: <defaults>
</compile_context>

<pallas_src>
import functools

import jax
import jax.numpy as jnp
from jax import lax
from jax.experimental import pallas as pl
from jax.experimental.pallas import tpu as pltpu


def _pick_row_tile(n, max_tile=256):
    """Largest multiple-of-8 divisor of n (capped at max_tile); falls back to n."""
    if n % 8 != 0:
        return n
    t = min(max_tile, n)
    t -= t % 8
    while n % t != 0:
        t -= 8
    return t


def scr_fused_kernel(ids_ref, mask_ref, emb_ref, w1_ref, b1_ref, w2_ref, b2_ref,
                     scores_ref, loss_ref, preds_ref, *, n_rows, n_tasks, seq_len):
    """Fused encoder stand-in + regression head + BCE loss + preds.

    ids_ref    : [TN, L]  int32    mask_ref  : [TN, L]  f32
    emb_ref    : [V, H]   bf16     (VMEM resident)
    w1_ref     : [H, 2H]  bf16     b1_ref    : [1, 2H]  f32
    w2_ref     : [2H, Tp] bf16     b2_ref    : [1, Tp]  f32   (Tp = lane-padded T)
    scores_ref : [TN, Tp] f32      (padded lanes are zero)
    loss_ref   : [1, 1]   f32      (output-resident accumulator across the grid)
    preds_ref  : [TN, 1]  f32
    """
    i = pl.program_id(0)

    @pl.when(i == 0)
    def _init():
        loss_ref[...] = jnp.zeros_like(loss_ref)

    tn = ids_ref.shape[0]
    vocab = emb_ref.shape[0]
    tpad = w2_ref.shape[1]

    ids = ids_ref[...]                                   # [TN, L] int32
    mask = mask_ref[...]                                 # [TN, L] f32

    # ---- encoder stand-in: embedding gather + masked mean -------------------
    # Realized as (one-hot token counts) @ (embedding table) so the "gather" runs
    # on the MXU from a VMEM-resident table and never touches HBM per token.
    # TODO(synk): the pretrained RoBERTa encoder has no clean Pallas equivalent;
    # this masked-mean embedding is a stand-in. At production L / vocab, replace
    # the static L loop + one-hot matmul with a scalar-prefetch row-gather
    # (pl.Element index_map) or a manual make_async_copy DMA gather.
    vocab_iota = lax.broadcasted_iota(jnp.int32, (tn, vocab), 1)   # hoisted once
    w_tok = jnp.zeros((tn, vocab), jnp.float32)
    for l in range(seq_len):                             # static, small L
        hit = (vocab_iota == ids[:, l:l + 1]).astype(jnp.float32)
        w_tok = w_tok + hit * mask[:, l:l + 1]

    denom = jnp.maximum(jnp.sum(mask, axis=1, keepdims=True), 1.0)  # [TN, 1]
    inv_denom = pl.reciprocal(denom, approx=True)
    encs = jnp.dot(w_tok.astype(jnp.bfloat16), emb_ref[...],
                   preferred_element_type=jnp.float32) * inv_denom  # [TN, H] f32

    # ---- regression head: Dropout(id) -> Linear(H,2H) -> Tanh -> Linear(2H,T) --
    h = jnp.tanh(
        jnp.dot(encs.astype(jnp.bfloat16), w1_ref[...],
                preferred_element_type=jnp.float32) + b1_ref[...])   # [TN, 2H] f32
    logits = (jnp.dot(h.astype(jnp.bfloat16), w2_ref[...],
                      preferred_element_type=jnp.float32) + b2_ref[...])  # [TN, Tp]

    task_mask = lax.broadcasted_iota(jnp.int32, (tn, tpad), 1) < n_tasks

    # ---- BCE-with-logits, accumulated across the row grid (mean at the end) ---
    x = logits
    z = scores_ref[...]
    bce = jnp.maximum(x, 0.0) - x * z + jnp.log1p(jnp.exp(-jnp.abs(x)))
    loss_ref[...] = loss_ref[...] + jnp.sum(jnp.where(task_mask, bce, 0.0),
                                            keepdims=True)

    @pl.when(i == pl.num_programs(0) - 1)
    def _finalize():
        # True element count N * T (padded lanes were masked out above).
        loss_ref[...] = loss_ref[...] * (1.0 / float(n_rows * n_tasks))

    # ---- preds = sigmoid(mean over true tasks) --------------------------------
    mean_logits = jnp.sum(jnp.where(task_mask, x, 0.0), axis=1,
                          keepdims=True) * (1.0 / float(n_tasks))     # [TN, 1]
    preds_ref[...] = pl.reciprocal(1.0 + jnp.exp(-mean_logits), approx=True)


def make_params(key, vocab_size, hidden_size, n_tasks):
    """Deterministic synthetic parameters (no checkpoint loading)."""
    k_emb, k_w1, k_b1, k_w2, k_b2 = jax.random.split(key, 5)
    H = hidden_size
    return {
        "embedding": jax.random.normal(k_emb, (vocab_size, H), jnp.float32) * 0.02,
        "w1": jax.random.normal(k_w1, (H, 2 * H), jnp.float32) * (1.0 / H) ** 0.5,
        "b1": jax.random.normal(k_b1, (1, 2 * H), jnp.float32) * 0.01,
        "w2": jax.random.normal(k_w2, (2 * H, n_tasks), jnp.float32) * (1.0 / (2 * H)) ** 0.5,
        "b2": jax.random.normal(k_b2, (1, n_tasks), jnp.float32) * 0.01,
    }


@jax.jit
def scr_forward(params, input_ids, attention_mask, target_ids,
                target_attention_mask, scores):
    """SCR.forward in eval mode (no sub-sampling), loss_type='BCE'.

    input_ids / attention_mask : [B, C, L]
    target_ids / target_attention_mask : [B, L]   (only used by the 'simcls' branch)
    scores : [B, C, T]
    returns {'loss': scalar, 'preds': [B, C]}
    """
    del target_ids, target_attention_mask
    B, C, L = input_ids.shape
    T = scores.shape[-1]
    V, H = params["embedding"].shape
    N = B * C
    TPAD = ((T + 127) // 128) * 128          # lane-dense task dimension
    TN = _pick_row_tile(N)                   # row tile (multiple of 8 when possible)
    num_tiles = N // TN

    # Wrapper-side layout plumbing (free): flatten to 2-D, pad T to 128 lanes,
    # narrow MXU operands to bf16 once.
    ids2d = input_ids.reshape(N, L).astype(jnp.int32)
    mask2d = attention_mask.reshape(N, L).astype(jnp.float32)
    scores2d = jnp.pad(scores.reshape(N, T).astype(jnp.float32),
                       ((0, 0), (0, TPAD - T)))
    emb = params["embedding"].astype(jnp.bfloat16)
    w1 = params["w1"].astype(jnp.bfloat16)
    b1 = params["b1"].astype(jnp.float32)
    w2 = jnp.pad(params["w2"], ((0, 0), (0, TPAD - T))).astype(jnp.bfloat16)
    b2 = jnp.pad(params["b2"], ((0, 0), (0, TPAD - T))).astype(jnp.float32)

    flops = int(2 * N * (V * H + 2 * H * H + 2 * H * TPAD)
                + 2 * N * L * V + 8 * N * TPAD)
    transcendentals = int(N * (2 * H + TPAD + 2))
    bytes_accessed = int(ids2d.size * 4 + mask2d.size * 4 + scores2d.size * 4
                         + emb.size * 2 + w1.size * 2 + b1.size * 4
                         + w2.size * 2 + b2.size * 4 + N * 4 + 4)

    kernel = functools.partial(scr_fused_kernel, n_rows=N, n_tasks=T, seq_len=L)

    loss, preds = pl.pallas_call(
        kernel,
        out_shape=(
            jax.ShapeDtypeStruct((1, 1), jnp.float32),   # loss (scalar, accumulator)
            jax.ShapeDtypeStruct((N, 1), jnp.float32),   # preds, one row per candidate
        ),
        grid_spec=pltpu.PrefetchScalarGridSpec(
            num_scalar_prefetch=0,
            grid=(num_tiles,),
            in_specs=[
                pl.BlockSpec((TN, L), lambda i: (i, 0)),             # input_ids tile
                pl.BlockSpec((TN, L), lambda i: (i, 0)),             # attention_mask tile
                pl.BlockSpec(memory_space=pltpu.MemorySpace.VMEM),   # embedding (resident)
                pl.BlockSpec(memory_space=pltpu.MemorySpace.VMEM),   # w1 (resident)
                pl.BlockSpec(memory_space=pltpu.MemorySpace.VMEM),   # b1 (resident)
                pl.BlockSpec(memory_space=pltpu.MemorySpace.VMEM),   # w2 (lane padded)
                pl.BlockSpec(memory_space=pltpu.MemorySpace.VMEM),   # b2 (lane padded)
                pl.BlockSpec((TN, TPAD), lambda i: (i, 0)),          # scores tile (lane padded)
            ],
            out_specs=(
                # Loss stays a (1,1) VMEM output-resident accumulator: the value is a
                # vector-reduce result, so it is kept on the vector path for robust
                # lowering instead of an SMEM scalar store.
                pl.BlockSpec((1, 1), lambda i: (0, 0)),
                pl.BlockSpec((TN, 1), lambda i: (i, 0)),
            ),
        ),
        compiler_params=pltpu.CompilerParams(
            # Loss accumulates across the row axis -> "arbitrary". On v7x one would
            # split it into per-core partials to mark it "parallel" for both TCs.
            dimension_semantics=("arbitrary",),
            vmem_limit_bytes=64 * 1024 * 1024,
        ),
        cost_estimate=pl.CostEstimate(flops=flops,
                                      transcendentals=transcendentals,
                                      bytes_accessed=bytes_accessed),
    )(ids2d, mask2d, emb, w1, b1, w2, b2, scores2d)

    return {"loss": loss[0, 0], "preds": preds.reshape(B, C)}


if __name__ == "__main__":
    # Small shapes consistent with the module's forward signature.
    batch_size = 2
    n_candidates = 8
    seq_len = 8
    hidden_size = 32
    n_tasks = 2
    vocab_size = 64

    key = jax.random.PRNGKey(0)
    k_params, k_ids, k_mask, k_scores, k_tids = jax.random.split(key, 5)

    params = make_params(k_params, vocab_size, hidden_size, n_tasks)

    input_ids = jax.random.randint(
        k_ids, (batch_size, n_candidates, seq_len), 0, vocab_size, jnp.int32)
    attention_mask = (jax.random.uniform(
        k_mask, (batch_size, n_candidates, seq_len)) > 0.2).astype(jnp.int32)
    # Ensure at least the first token is attended (CLS-like).
    attention_mask = attention_mask.at[..., 0].set(1)
    target_ids = jax.random.randint(
        k_tids, (batch_size, seq_len), 0, vocab_size, jnp.int32)
    target_attention_mask = jnp.ones((batch_size, seq_len), jnp.int32)
    scores = jax.random.uniform(
        k_scores, (batch_size, n_candidates, n_tasks), jnp.float32)

    out = scr_forward(params, input_ids, attention_mask, target_ids,
                      target_attention_mask, scores)
    jax.block_until_ready(out)

    assert out["loss"].shape == ()
    assert out["preds"].shape == (batch_size, n_candidates)
    assert bool(jnp.isfinite(out["loss"]))
    assert bool(jnp.all(jnp.isfinite(out["preds"])))
    assert bool(jnp.all((out["preds"] >= 0.0) & (out["preds"] <= 1.0)))
    print("KERNEL_OK")
</pallas_src>

<mosaic_0001>
module attributes {stable_mosaic.version = 11 : i64} {
  func.func @scr_fused_kernel(%arg0: i32, %arg1: memref<16x8xi32, #tpu.memory_space<vmem>>, %arg2: memref<16x8xf32, #tpu.memory_space<vmem>>, %arg3: memref<64x32xbf16, #tpu.memory_space<vmem>>, %arg4: memref<32x64xbf16, #tpu.memory_space<vmem>>, %arg5: memref<1x64xf32, #tpu.memory_space<vmem>>, %arg6: memref<64x128xbf16, #tpu.memory_space<vmem>>, %arg7: memref<1x128xf32, #tpu.memory_space<vmem>>, %arg8: memref<16x128xf32, #tpu.memory_space<vmem>>, %arg9: memref<1x1xf32, #tpu.memory_space<vmem>>, %arg10: memref<16x1xf32, #tpu.memory_space<vmem>>) attributes {dimension_semantics = [#tpu.dimension_semantics<arbitrary>], iteration_bounds = array<i64: 1>, scalar_prefetch = 0 : i64, scratch_operands = 0 : i64, tpu.core_type = #tpu.core_type<tc>, window_params = [{transform_indices = @transform_0, window_bounds = array<i64: 16, 8>}, {transform_indices = @transform_1, window_bounds = array<i64: 16, 8>}, {pipeline_mode = #tpu.pipeline_mode<synchronous>, transform_indices = @transform_2, window_bounds = array<i64: 64, 32>}, {pipeline_mode = #tpu.pipeline_mode<synchronous>, transform_indices = @transform_3, window_bounds = array<i64: 32, 64>}, {pipeline_mode = #tpu.pipeline_mode<synchronous>, transform_indices = @transform_4, window_bounds = array<i64: 1, 64>}, {pipeline_mode = #tpu.pipeline_mode<synchronous>, transform_indices = @transform_5, window_bounds = array<i64: 64, 128>}, {pipeline_mode = #tpu.pipeline_mode<synchronous>, transform_indices = @transform_6, window_bounds = array<i64: 1, 128>}, {transform_indices = @transform_7, window_bounds = array<i64: 16, 128>}, {pipeline_mode = #tpu.pipeline_mode<synchronous>, transform_indices = @transform_8, window_bounds = array<i64: 1, 1>}, {transform_indices = @transform_9, window_bounds = array<i64: 16, 1>}]} {
    %c0_i32 = arith.constant 0 : i32
    %0 = arith.cmpi eq, %arg0, %c0_i32 : i32
    %1 = arith.extui %0 : i1 to i32
    %c0_i32_0 = arith.constant 0 : i32
    %2 = arith.cmpi ne, %1, %c0_i32_0 : i32
    scf.if %2 {
      %cst_38 = arith.constant 0.000000e+00 : f32
      %142 = vector.broadcast %cst_38 : f32 to vector<1x1xf32>
      %c0_39 = arith.constant 0 : index
      %c0_40 = arith.constant 0 : index
      %143 = vector.load %arg9[%c0_39, %c0_40] : memref<1x1xf32, #tpu.memory_space<vmem>>, vector<1x1xf32>
      tpu.vector_store %arg9[%c0_39, %c0_40], %142 {strides = array<i32>} : memref<1x1xf32, #tpu.memory_space<vmem>>, vector<1x1xf32>,
    } else {
    }
    %c0 = arith.constant 0 : index
    %c0_1 = arith.constant 0 : index
    %3 = vector.load %arg1[%c0, %c0_1] : memref<16x8xi32, #tpu.memory_space<vmem>>, vector<16x8xi32>
    %c0_2 = arith.constant 0 : index
    %c0_3 = arith.constant 0 : index
    %4 = vector.load %arg2[%c0_2, %c0_3] : memref<16x8xf32, #tpu.memory_space<vmem>>, vector<16x8xf32>
    %5 = tpu.iota {dimensions = array<i32: 1>} : vector<16x64xi32>
    %cst = arith.constant 0.000000e+00 : f32
    %6 = vector.broadcast %cst : f32 to vector<16x64xf32>
    %7 = vector.extract_strided_slice %3 {offsets = [0, 0], sizes = [16, 1], strides = [1, 1]} : vector<16x8xi32> to vector<16x1xi32>
    %8 = vector.broadcast %7 : vector<16x1xi32> to vector<16x64xi32>
    %9 = arith.cmpi eq, %5, %8 : vector<16x64xi32>
    %10 = arith.extui %9 : vector<16x64xi1> to vector<16x64xi32>
    %11 = arith.sitofp %10 : vector<16x64xi32> to vector<16x64xf32>
    %12 = vector.extract_strided_slice %4 {offsets = [0, 0], sizes = [16, 1], strides = [1, 1]} : vector<16x8xf32> to vector<16x1xf32>
    %13 = vector.broadcast %12 : vector<16x1xf32> to vector<16x64xf32>
    %14 = arith.mulf %11, %13 : vector<16x64xf32>
    %15 = arith.addf %6, %14 : vector<16x64xf32>
    %16 = vector.extract_strided_slice %3 {offsets = [0, 1], sizes = [16, 1], strides = [1, 1]} : vector<16x8xi32> to vector<16x1xi32>
    %17 = vector.broadcast %16 : vector<16x1xi32> to vector<16x64xi32>
    %18 = arith.cmpi eq, %5, %17 : vector<16x64xi32>
    %19 = arith.extui %18 : vector<16x64xi1> to vector<16x64xi32>
    %20 = arith.sitofp %19 : vector<16x64xi32> to vector<16x64xf32>
    %21 = vector.extract_strided_slice %4 {offsets = [0, 1], sizes = [16, 1], strides = [1, 1]} : vector<16x8xf32> to vector<16x1xf32>
    %22 = vector.broadcast %21 : vector<16x1xf32> to vector<16x64xf32>
    %23 = arith.mulf %20, %22 : vector<16x64xf32>
    %24 = arith.addf %15, %23 : vector<16x64xf32>
    %25 = vector.extract_strided_slice %3 {offsets = [0, 2], sizes = [16, 1], strides = [1, 1]} : vector<16x8xi32> to vector<16x1xi32>
    %26 = vector.broadcast %25 : vector<16x1xi32> to vector<16x64xi32>
    %27 = arith.cmpi eq, %5, %26 : vector<16x64xi32>
    %28 = arith.extui %27 : vector<16x64xi1> to vector<16x64xi32>
    %29 = arith.sitofp %28 : vector<16x64xi32> to vector<16x64xf32>
    %30 = vector.extract_strided_slice %4 {offsets = [0, 2], sizes = [16, 1], strides = [1, 1]} : vector<16x8xf32> to vector<16x1xf32>
    %31 = vector.broadcast %30 : vector<16x1xf32> to vector<16x64xf32>
    %32 = arith.mulf %29, %31 : vector<16x64xf32>
    %33 = arith.addf %24, %32 : vector<16x64xf32>
    %34 = vector.extract_strided_slice %3 {offsets = [0, 3], sizes = [16, 1], strides = [1, 1]} : vector<16x8xi32> to vector<16x1xi32>
    %35 = vector.broadcast %34 : vector<16x1xi32> to vector<16x64xi32>
    %36 = arith.cmpi eq, %5, %35 : vector<16x64xi32>
    %37 = arith.extui %36 : vector<16x64xi1> to vector<16x64xi32>
    %38 = arith.sitofp %37 : vector<16x64xi32> to vector<16x64xf32>
    %39 = vector.extract_strided_slice %4 {offsets = [0, 3], sizes = [16, 1], strides = [1, 1]} : vector<16x8xf32> to vector<16x1xf32>
    %40 = vector.broadcast %39 : vector<16x1xf32> to vector<16x64xf32>
    %41 = arith.mulf %38, %40 : vector<16x64xf32>
    %42 = arith.addf %33, %41 : vector<16x64xf32>
    %43 = vector.extract_strided_slice %3 {offsets = [0, 4], sizes = [16, 1], strides = [1, 1]} : vector<16x8xi32> to vector<16x1xi32>
    %44 = vector.broadcast %43 : vector<16x1xi32> to vector<16x64xi32>
    %45 = arith.cmpi eq, %5, %44 : vector<16x64xi32>
    %46 = arith.extui %45 : vector<16x64xi1> to vector<16x64xi32>
    %47 = arith.sitofp %46 : vector<16x64xi32> to vector<16x64xf32>
    %48 = vector.extract_strided_slice %4 {offsets = [0, 4], sizes = [16, 1], strides = [1, 1]} : vector<16x8xf32> to vector<16x1xf32>
    %49 = vector.broadcast %48 : vector<16x1xf32> to vector<16x64xf32>
    %50 = arith.mulf %47, %49 : vector<16x64xf32>
    %51 = arith.addf %42, %50 : vector<16x64xf32>
    %52 = vector.extract_strided_slice %3 {offsets = [0, 5], sizes = [16, 1], strides = [1, 1]} : vector<16x8xi32> to vector<16x1xi32>
    %53 = vector.broadcast %52 : vector<16x1xi32> to vector<16x64xi32>
    %54 = arith.cmpi eq, %5, %53 : vector<16x64xi32>
    %55 = arith.extui %54 : vector<16x64xi1> to vector<16x64xi32>
    %56 = arith.sitofp %55 : vector<16x64xi32> to vector<16x64xf32>
    %57 = vector.extract_strided_slice %4 {offsets = [0, 5], sizes = [16, 1], strides = [1, 1]} : vector<16x8xf32> to vector<16x1xf32>
    %58 = vector.broadcast %57 : vector<16x1xf32> to vector<16x64xf32>
    %59 = arith.mulf %56, %58 : vector<16x64xf32>
    %60 = arith.addf %51, %59 : vector<16x64xf32>
    %61 = vector.extract_strided_slice %3 {offsets = [0, 6], sizes = [16, 1], strides = [1, 1]} : vector<16x8xi32> to vector<16x1xi32>
    %62 = vector.broadcast %61 : vector<16x1xi32> to vector<16x64xi32>
    %63 = arith.cmpi eq, %5, %62 : vector<16x64xi32>
    %64 = arith.extui %63 : vector<16x64xi1> to vector<16x64xi32>
    %65 = arith.sitofp %64 : vector<16x64xi32> to vector<16x64xf32>
    %66 = vector.extract_strided_slice %4 {offsets = [0, 6], sizes = [16, 1], strides = [1, 1]} : vector<16x8xf32> to vector<16x1xf32>
    %67 = vector.broadcast %66 : vector<16x1xf32> to vector<16x64xf32>
    %68 = arith.mulf %65, %67 : vector<16x64xf32>
    %69 = arith.addf %60, %68 : vector<16x64xf32>
    %70 = vector.extract_strided_slice %3 {offsets = [0, 7], sizes = [16, 1], strides = [1, 1]} : vector<16x8xi32> to vector<16x1xi32>
    %71 = vector.broadcast %70 : vector<16x1xi32> to vector<16x64xi32>
    %72 = arith.cmpi eq, %5, %71 : vector<16x64xi32>
    %73 = arith.extui %72 : vector<16x64xi1> to vector<16x64xi32>
    %74 = arith.sitofp %73 : vector<16x64xi32> to vector<16x64xf32>
    %75 = vector.extract_strided_slice %4 {offsets = [0, 7], sizes = [16, 1], strides = [1, 1]} : vector<16x8xf32> to vector<16x1xf32>
    %76 = vector.broadcast %75 : vector<16x1xf32> to vector<16x64xf32>
    %77 = arith.mulf %74, %76 : vector<16x64xf32>
    %78 = arith.addf %69, %77 : vector<16x64xf32>
    %cst_4 = arith.constant dense<0.000000e+00> : vector<16xf32>
    %79 = vector.multi_reduction <add>, %4, %cst_4 [1] : vector<16x8xf32> to vector<16xf32>
    %80 = vector.shape_cast %79 : vector<16xf32> to vector<16x1xf32>
    %cst_5 = arith.constant 1.000000e+00 : f32
    %81 = vector.broadcast %cst_5 : f32 to vector<16x1xf32>
    %82 = arith.maximumf %80, %81 : vector<16x1xf32>
    %83 = tpu.reciprocal %82 {approx = true} : vector<16x1xf32> -> vector<16x1xf32>
    %84 = arith.truncf %78 : vector<16x64xf32> to vector<16x64xbf16>
    %c0_6 = arith.constant 0 : index
    %c0_7 = arith.constant 0 : index
    %85 = vector.load %arg3[%c0_6, %c0_7] : memref<64x32xbf16, #tpu.memory_space<vmem>>, vector<64x32xbf16>
    %cst_8 = arith.constant dense<0.000000e+00> : vector<16x32xf32>
    %86 = tpu.matmul %84, %85, %cst_8 {dimension_numbers = #tpu.dot_dimension_numbers<[1], [0], [0], [1], [0, 0, 1, 1], [], []>} : vector<16x64xbf16>, vector<64x32xbf16>, vector<16x32xf32> -> vector<16x32xf32>
    %87 = vector.broadcast %83 : vector<16x1xf32> to vector<16x32xf32>
    %88 = arith.mulf %86, %87 : vector<16x32xf32>
    %89 = arith.truncf %88 : vector<16x32xf32> to vector<16x32xbf16>
    %c0_9 = arith.constant 0 : index
    %c0_10 = arith.constant 0 : index
    %90 = vector.load %arg4[%c0_9, %c0_10] : memref<32x64xbf16, #tpu.memory_space<vmem>>, vector<32x64xbf16>
    %cst_11 = arith.constant dense<0.000000e+00> : vector<16x64xf32>
    %91 = tpu.matmul %89, %90, %cst_11 {dimension_numbers = #tpu.dot_dimension_numbers<[1], [0], [0], [1], [0, 0, 1, 1], [], []>} : vector<16x32xbf16>, vector<32x64xbf16>, vector<16x64xf32> -> vector<16x64xf32>
    %c0_12 = arith.constant 0 : index
    %c0_13 = arith.constant 0 : index
    %92 = vector.load %arg5[%c0_12, %c0_13] : memref<1x64xf32, #tpu.memory_space<vmem>>, vector<1x64xf32>
    %93 = vector.broadcast %92 : vector<1x64xf32> to vector<16x64xf32>
    %94 = arith.addf %91, %93 : vector<16x64xf32>
    %95 = math.tanh %94 : vector<16x64xf32>
    %96 = arith.truncf %95 : vector<16x64xf32> to vector<16x64xbf16>
    %c0_14 = arith.constant 0 : index
    %c0_15 = arith.constant 0 : index
    %97 = vector.load %arg6[%c0_14, %c0_15] : memref<64x128xbf16, #tpu.memory_space<vmem>>, vector<64x128xbf16>
    %cst_16 = arith.constant dense<0.000000e+00> : vector<16x128xf32>
    %98 = tpu.matmul %96, %97, %cst_16 {dimension_numbers = #tpu.dot_dimension_numbers<[1], [0], [0], [1], [0, 0, 1, 1], [], []>} : vector<16x64xbf16>, vector<64x128xbf16>, vector<16x128xf32> -> vector<16x128xf32>
    %c0_17 = arith.constant 0 : index
    %c0_18 = arith.constant 0 : index
    %99 = vector.load %arg7[%c0_17, %c0_18] : memref<1x128xf32, #tpu.memory_space<vmem>>, vector<1x128xf32>
    %100 = vector.broadcast %99 : vector<1x128xf32> to vector<16x128xf32>
    %101 = arith.addf %98, %100 : vector<16x128xf32>
    %102 = tpu.iota {dimensions = array<i32: 1>} : vector<16x128xi32>
    %c2_i32 = arith.constant 2 : i32
    %103 = vector.broadcast %c2_i32 : i32 to vector<16x128xi32>
    %104 = arith.cmpi slt, %102, %103 : vector<16x128xi32>
    %c0_19 = arith.constant 0 : index
    %c0_20 = arith.constant 0 : index
    %105 = vector.load %arg8[%c0_19, %c0_20] : memref<16x128xf32, #tpu.memory_space<vmem>>, vector<16x128xf32>
    %cst_21 = arith.constant 0.000000e+00 : f32
    %106 = vector.broadcast %cst_21 : f32 to vector<16x128xf32>
    %107 = arith.maximumf %101, %106 : vector<16x128xf32>
    %108 = arith.mulf %101, %105 : vector<16x128xf32>
    %109 = arith.subf %107, %108 : vector<16x128xf32>
    %110 = math.absf %101 : vector<16x128xf32>
    %cst_22 = arith.constant 0.000000e+00 : f32
    %111 = vector.broadcast %cst_22 : f32 to vector<16x128xf32>
    %112 = arith.subf %111, %110 : vector<16x128xf32>
    %113 = math.exp %112 : vector<16x128xf32>
    %114 = math.log1p %113 : vector<16x128xf32>
    %115 = arith.addf %109, %114 : vector<16x128xf32>
    %c0_23 = arith.constant 0 : index
    %c0_24 = arith.constant 0 : index
    %116 = vector.load %arg9[%c0_23, %c0_24] : memref<1x1xf32, #tpu.memory_space<vmem>>, vector<1x1xf32>
    %cst_25 = arith.constant 0.000000e+00 : f32
    %117 = vector.broadcast %cst_25 : f32 to vector<16x128xf32>
    %118 = arith.select %104, %115, %117 : vector<16x128xi1>, vector<16x128xf32>
    %119 = vector.shape_cast %118 : vector<16x128xf32> to vector<1x16x128xf32>
    %cst_26 = arith.constant dense<0.000000e+00> : vector<1xf32>
    %120 = vector.multi_reduction <add>, %119, %cst_26 [1, 2] : vector<1x16x128xf32> to vector<1xf32>
    %121 = vector.shape_cast %120 : vector<1xf32> to vector<1x1x1xf32>
    %122 = vector.extract %121[0, 0, 0] : f32 from vector<1x1x1xf32>
    %123 = vector.broadcast %122 : f32 to vector<1x1xf32>
    %124 = arith.addf %116, %123 : vector<1x1xf32>
    %c0_27 = arith.constant 0 : index
    %c0_28 = arith.constant 0 : index
    %125 = vector.load %arg9[%c0_27, %c0_28] : memref<1x1xf32, #tpu.memory_space<vmem>>, vector<1x1xf32>
    tpu.vector_store %arg9[%c0_27, %c0_28], %124 {strides = array<i32>} : memref<1x1xf32, #tpu.memory_space<vmem>>, vector<1x1xf32>,
    %c0_i32_29 = arith.constant 0 : i32
    %126 = arith.cmpi eq, %arg0, %c0_i32_29 : i32
    %127 = arith.extui %126 : i1 to i32
    %c0_i32_30 = arith.constant 0 : i32
    %128 = arith.cmpi ne, %127, %c0_i32_30 : i32
    scf.if %128 {
      %c0_38 = arith.constant 0 : index
      %c0_39 = arith.constant 0 : index
      %142 = vector.load %arg9[%c0_38, %c0_39] : memref<1x1xf32, #tpu.memory_space<vmem>>, vector<1x1xf32>
      %cst_40 = arith.constant 3.125000e-02 : f32
      %143 = vector.broadcast %cst_40 : f32 to vector<1x1xf32>
      %144 = arith.mulf %142, %143 : vector<1x1xf32>
      %c0_41 = arith.constant 0 : index
      %c0_42 = arith.constant 0 : index
      %145 = vector.load %arg9[%c0_41, %c0_42] : memref<1x1xf32, #tpu.memory_space<vmem>>, vector<1x1xf32>
      tpu.vector_store %arg9[%c0_41, %c0_42], %144 {strides = array<i32>} : memref<1x1xf32, #tpu.memory_space<vmem>>, vector<1x1xf32>,
    } else {
    }
    %cst_31 = arith.constant 0.000000e+00 : f32
    %129 = vector.broadcast %cst_31 : f32 to vector<16x128xf32>
    %130 = arith.select %104, %101, %129 : vector<16x128xi1>, vector<16x128xf32>
    %cst_32 = arith.constant dense<0.000000e+00> : vector<16xf32>
    %131 = vector.multi_reduction <add>, %130, %cst_32 [1] : vector<16x128xf32> to vector<16xf32>
    %132 = vector.shape_cast %131 : vector<16xf32> to vector<16x1xf32>
    %cst_33 = arith.constant 5.000000e-01 : f32
    %133 = vector.broadcast %cst_33 : f32 to vector<16x1xf32>
    %134 = arith.mulf %132, %133 : vector<16x1xf32>
    %cst_34 = arith.constant 0.000000e+00 : f32
    %135 = vector.broadcast %cst_34 : f32 to vector<16x1xf32>
    %136 = arith.subf %135, %134 : vector<16x1xf32>
    %137 = math.exp %136 : vector<16x1xf32>
    %cst_35 = arith.constant 1.000000e+00 : f32
    %138 = vector.broadcast %cst_35 : f32 to vector<16x1xf32>
    %139 = arith.addf %138, %137 : vector<16x1xf32>
    %140 = tpu.reciprocal %139 {approx = true} : vector<16x1xf32> -> vector<16x1xf32>
    %c0_36 = arith.constant 0 : index
    %c0_37 = arith.constant 0 : index
    %141 = vector.load %arg10[%c0_36, %c0_37] : memref<16x1xf32, #tpu.memory_space<vmem>>, vector<16x1xf32>
    tpu.vector_store %arg10[%c0_36, %c0_37], %140 {strides = array<i32>} : memref<16x1xf32, #tpu.memory_space<vmem>>, vector<16x1xf32>,
    return
  }
  func.func @transform_0(%arg0: i32) -> (i32, i32) {
    %c0_i32 = arith.constant 0 : i32
    %c0_i32_0 = arith.constant 0 : i32
    return %arg0, %c0_i32 : i32, i32
  }
  func.func @transform_1(%arg0: i32) -> (i32, i32) {
    %c0_i32 = arith.constant 0 : i32
    %c0_i32_0 = arith.constant 0 : i32
    return %arg0, %c0_i32 : i32, i32
  }
  func.func @transform_2(%arg0: i32) -> (i32, i32) {
    %c0_i32 = arith.constant 0 : i32
    %c0_i32_0 = arith.constant 0 : i32
    %c0_i32_1 = arith.constant 0 : i32
    return %c0_i32, %c0_i32_0 : i32, i32
  }
  func.func @transform_3(%arg0: i32) -> (i32, i32) {
    %c0_i32 = arith.constant 0 : i32
    %c0_i32_0 = arith.constant 0 : i32
    %c0_i32_1 = arith.constant 0 : i32
    return %c0_i32, %c0_i32_0 : i32, i32
  }
  func.func @transform_4(%arg0: i32) -> (i32, i32) {
    %c0_i32 = arith.constant 0 : i32
    %c0_i32_0 = arith.constant 0 : i32
    %c0_i32_1 = arith.constant 0 : i32
    return %c0_i32, %c0_i32_0 : i32, i32
  }
  func.func @transform_5(%arg0: i32) -> (i32, i32) {
    %c0_i32 = arith.constant 0 : i32
    %c0_i32_0 = arith.constant 0 : i32
    %c0_i32_1 = arith.constant 0 : i32
    return %c0_i32, %c0_i32_0 : i32, i32
  }
  func.func @transform_6(%arg0: i32) -> (i32, i32) {
    %c0_i32 = arith.constant 0 : i32
    %c0_i32_0 = arith.constant 0 : i32
    %c0_i32_1 = arith.constant 0 : i32
    return %c0_i32, %c0_i32_0 : i32, i32
  }
  func.func @transform_7(%arg0: i32) -> (i32, i32) {
    %c0_i32 = arith.constant 0 : i32
    %c0_i32_0 = arith.constant 0 : i32
    return %arg0, %c0_i32 : i32, i32
  }
  func.func @transform_8(%arg0: i32) -> (i32, i32) {
    %c0_i32 = arith.constant 0 : i32
    %c0_i32_0 = arith.constant 0 : i32
    %c0_i32_1 = arith.constant 0 : i32
    return %c0_i32, %c0_i32_0 : i32, i32
  }
  func.func @transform_9(%arg0: i32) -> (i32, i32) {
    %c0_i32 = arith.constant 0 : i32
    %c0_i32_0 = arith.constant 0 : i32
    return %arg0, %c0_i32 : i32, i32
  }
}

</mosaic_0001>

<bundles_post_ra>
// kernel: scr_forward.1
= control target key start
LH: loop header
LB: loop body
LE: loop exit
PB: predicated region body
PF: predicated region fallthrough
CT: control target
= control target key end

     0   :  { %15 = vsyncpa [#allocation3], 0  ;;  %s1398_s0 = inlined_call_operand.hbm [shape: s32[16,8], index: 0, kind: input, shape index: {}]   ;;  %s1399_s1 = inlined_call_operand.hbm [shape: f32[16,8], index: 1, kind: input, shape index: {}]   ;;  %s1400_s2 = inlined_call_operand.hbm [shape: bf16[64,32], index: 2, kind: input, shape index: {}]   ;;  %s1401_s3 = inlined_call_operand.hbm [shape: bf16[32,64], index: 3, kind: input, shape index: {}]   ;;  %s1402_s4 = inlined_call_operand.hbm [shape: f32[1,64], index: 4, kind: input, shape index: {}]   ;;  %s1403_s5 = inlined_call_operand.hbm [shape: bf16[64,128], index: 5, kind: input, shape index: {}]   ;;  %s1404_s6 = inlined_call_operand.hbm [shape: f32[1,128], index: 6, kind: input, shape index: {}]   ;;  %s1405_s7 = inlined_call_operand.hbm [shape: f32[16,128], index: 7, kind: input, shape index: {}]   ;;  %s1406_s8 = inlined_call_operand.hbm [shape: f32[1,1], index: 8, kind: output, shape index: {0}]   ;;  %s1407_s9 = inlined_call_operand.hbm [shape: f32[16,1], index: 9, kind: output, shape index: {1}]  }
   0x1   :  { %16 = vsyncpa [#allocation6], 0 }
   0x2   :  { %17 = vsyncpa [#allocation9], 0 }
   0x3   :  { %18 = vsyncpa [#allocation12], 0 }
   0x4   :  { %19 = vsyncpa [#allocation15], 0 }
   0x5   :  { %20 = vsyncpa [#allocation4], 0 }
   0x6   :  { %21 = vsyncpa [#allocation18], 0  ;;  %s1094_s30 = smov [#allocation5]   ;;  %s860_s13 = scalar_lea.hbm %s1399_s1, 256 }
   0x7   :  { %s39_s10 = sshll.u32 %s1094_s30, 4  ;;  %p861_p0 = scmp.ne.s32.totalorder %s1399_s1, %s860_s13  ;;  %s40_s10 = int_to_ptr.vmem [resolvable:$true] %s39_s10 }
   0x8   :  { %p864_p1 = scmp.lt.u32.totalorder %s860_s13, %s1399_s1 }
   0xa   :  { %p866_p2 = pnand %p864_p1, %p861_p0 }
   0xc   :  { %869 = shalt.err (!%p866_p2)
}
   0xd   :  { %s870_s18 = scalar_lea.vmem %s40_s10, 256  ;;  %p875_p4 = scmp.lt.s32.totalorder %s40_s10, %s40_s10 }
   0xe   :  { %p871_p3 = scmp.ne.s32.totalorder %s40_s10, %s870_s18  ;;  %p876_p5 = scmp.lt.s32.totalorder %s870_s18, %s870_s18 }
  0x10   :  { %p877_p6 = por %p876_p5, %p875_p4 }
  0x12   :  { %p878_p7 = pnand %p877_p6, %p871_p3 }
  0x14   :  { %881 = shalt.err (!%p878_p7)
}
  0x15   :  { %s1095_s19 = smov 128   ;;  %s1096_s20 = smov 8  }
  0x16   :  { %45 = dma.hbm_to_vmem [thread:$0]  %s1399_s1, 256, %s40_s10, [#allocation6], %s1095_s19, %s1095_s19, %s1096_s20  }
  0x17   :  { %s1097_s23 = smov [#allocation8]   ;;  %s1098_s25 = smov [#allocation11]  }
  0x18   :  { %s63_s24 = sshll.u32 %s1097_s23, 4  ;;  %s85_s26 = sshll.u32 %s1098_s25, 4  ;;  %s64_s24 = int_to_ptr.vmem [resolvable:$true] %s63_s24  ;;  %s86_s26 = int_to_ptr.vmem [resolvable:$true] %s85_s26 }
  0x19   :  { %s882_s29 = scalar_lea.hbm %s1401_s3, 256 }
  0x1a   :  { %p883_p8 = scmp.ne.s32.totalorder %s1401_s3, %s882_s29  ;;  %p886_p9 = scmp.lt.u32.totalorder %s882_s29, %s1401_s3 }
  0x1c   :  { %p888_p10 = pnand %p886_p9, %p883_p8 }
  0x1e   :  { %891 = shalt.err (!%p888_p10)
}
  0x1f   :  { %s892_s1 = scalar_lea.vmem %s64_s24, 256  ;;  %p897_p12 = scmp.lt.s32.totalorder %s64_s24, %s64_s24 }
  0x20   :  { %p893_p11 = scmp.ne.s32.totalorder %s64_s24, %s892_s1  ;;  %p898_p13 = scmp.lt.s32.totalorder %s892_s1, %s892_s1 }
  0x22   :  { %p899_p0 = por %p898_p13, %p897_p12 }
  0x24   :  { %p900_p1 = pnand %p899_p0, %p893_p11 }
  0x26   :  { %903 = shalt.err (!%p900_p1)
}
  0x27   :  { %s1099_s10 = smov 64   ;;  %s1100_s14 = smov 4  }
  0x28   :  { %69 = dma.hbm_to_vmem [thread:$0]  %s1401_s3, 256, %s64_s24, [#allocation9], %s1099_s10, %s1099_s10, %s1100_s14  }
  0x29   :  { %s904_s21 = scalar_lea.hbm %s1403_s5, 512 }
  0x2a   :  { %p905_p2 = scmp.ne.s32.totalorder %s1403_s5, %s904_s21  ;;  %p908_p3 = scmp.lt.u32.totalorder %s904_s21, %s1403_s5 }
  0x2c   :  { %p910_p4 = pnand %p908_p3, %p905_p2 }
  0x2e   :  { %913 = shalt.err (!%p910_p4)
}
  0x2f   :  { %s914_s28 = scalar_lea.vmem %s86_s26, 512  ;;  %p919_p6 = scmp.lt.s32.totalorder %s86_s26, %s86_s26 }
  0x30   :  { %p915_p5 = scmp.ne.s32.totalorder %s86_s26, %s914_s28  ;;  %p920_p7 = scmp.lt.s32.totalorder %s914_s28, %s914_s28 }
  0x32   :  { %p921_p8 = por %p920_p7, %p919_p6 }
  0x34   :  { %p922_p9 = pnand %p921_p8, %p915_p5 }
  0x36   :  { %925 = shalt.err (!%p922_p9)
}
  0x37   :  { %91 = dma.hbm_to_vmem [thread:$0]  %s1403_s5, 512, %s86_s26, [#allocation12], %s1099_s10, %s1099_s10, %s1100_s14  }
  0x38   :  { %s1101_s29 = smov [#allocation2]   ;;  %s1102_s11 = smov [#allocation7]  }
  0x39   :  { %s27_s30 = sshll.u32 %s1101_s29, 4  ;;  %s51_s12 = sshll.u32 %s1102_s11, 4  ;;  %s28_s30 = int_to_ptr.vmem [resolvable:$true] %s27_s30  ;;  %s52_s12 = int_to_ptr.vmem [resolvable:$true] %s51_s12 }
  0x3a   :  { %s926_s15 = scalar_lea.hbm %s1398_s0, 256 }
  0x3b   :  { %p927_p10 = scmp.ne.s32.totalorder %s1398_s0, %s926_s15  ;;  %p930_p11 = scmp.lt.u32.totalorder %s926_s15, %s1398_s0 }
  0x3d   :  { %p932_p12 = pnand %p930_p11, %p927_p10 }
  0x3f   :  { %935 = shalt.err (!%p932_p12)
}
  0x40   :  { %s936_s5 = scalar_lea.vmem %s28_s30, 256  ;;  %p941_p0 = scmp.lt.s32.totalorder %s28_s30, %s28_s30 }
  0x41   :  { %p937_p13 = scmp.ne.s32.totalorder %s28_s30, %s936_s5  ;;  %p942_p1 = scmp.lt.s32.totalorder %s936_s5, %s936_s5 }
  0x43   :  { %p943_p2 = por %p942_p1, %p941_p0 }
  0x45   :  { %p944_p3 = pnand %p943_p2, %p937_p13 }
  0x47   :  { %947 = shalt.err (!%p944_p3)
}
  0x48   :  { %33 = dma.hbm_to_vmem [thread:$0]  %s1398_s0, 256, %s28_s30, [#allocation3], %s1095_s19, %s1095_s19, %s1096_s20  }
  0x49   :  { %s948_s27 = scalar_lea.hbm %s1400_s2, 512 }
  0x4a   :  { %p949_p4 = scmp.ne.s32.totalorder %s1400_s2, %s948_s27  ;;  %p952_p5 = scmp.lt.u32.totalorder %s948_s27, %s1400_s2 }
  0x4c   :  { %p954_p6 = pnand %p952_p5, %p949_p4 }
  0x4e   :  { %957 = shalt.err (!%p954_p6)
}
  0x4f   :  { %s958_s11 = scalar_lea.vmem %s52_s12, 512  ;;  %p963_p8 = scmp.lt.s32.totalorder %s52_s12, %s52_s12 }
  0x50   :  { %p959_p7 = scmp.ne.s32.totalorder %s52_s12, %s958_s11  ;;  %p964_p9 = scmp.lt.s32.totalorder %s958_s11, %s958_s11 }
  0x52   :  { %p965_p10 = por %p964_p9, %p963_p8 }
  0x54   :  { %p966_p11 = pnand %p965_p10, %p959_p7 }
  0x56   :  { %969 = shalt.err (!%p966_p11)
}
  0x57   :  { %57 = dma.hbm_to_vmem [thread:$0]  %s1400_s2, 512, %s52_s12, [#allocation6], %s1099_s10, %s1099_s10, %s1100_s14  }
  0x58   :  { %s1103_s13 = smov [#allocation10]   ;;  %s1104_s15 = smov [#allocation13]  }
  0x59   :  { %s76_s1 = sshll.u32 %s1103_s13, 4  ;;  %s98_s16 = sshll.u32 %s1104_s15, 4  ;;  %s77_s1 = int_to_ptr.vmem [resolvable:$true] %s76_s1  ;;  %s99_s16 = int_to_ptr.vmem [resolvable:$true] %s98_s16 }
  0x5a   :  { %s970_s21 = scalar_lea.hbm %s1402_s4, 16 }
  0x5b   :  { %p971_p12 = scmp.ne.s32.totalorder %s1402_s4, %s970_s21  ;;  %p974_p13 = scmp.lt.u32.totalorder %s970_s21, %s1402_s4 }
  0x5d   :  { %p976_p0 = pnand %p974_p13, %p971_p12 }
  0x5f   :  { %979 = shalt.err (!%p976_p0)
}
  0x60   :  { %s980_s2 = scalar_lea.vmem %s77_s1, 16  ;;  %s984_s10 = scalar_lea.vmem %s77_s1, 32 }
  0x61   :  { %p981_p1 = scmp.ne.s32.totalorder %s77_s1, %s980_s2  ;;  %p985_p2 = scmp.lt.s32.totalorder %s77_s1, %s77_s1 }
  0x62   :  { %p986_p3 = scmp.lt.s32.totalorder %s984_s10, %s980_s2 }
  0x64   :  { %p987_p4 = por %p986_p3, %p985_p2 }
  0x66   :  { %p988_p5 = pnand %p987_p4, %p981_p1 }
  0x68   :  { %991 = shalt.err (!%p988_p5)
}
  0x69   :  { %79 = dma.hbm_to_vmem [thread:$0]  %s1402_s4, 16, %s77_s1, [#allocation9]  }
  0x6a   :  { %s992_s28 = scalar_lea.hbm %s1404_s6, 16 }
  0x6b   :  { %p993_p6 = scmp.ne.s32.totalorder %s1404_s6, %s992_s28  ;;  %p996_p7 = scmp.lt.u32.totalorder %s992_s28, %s1404_s6 }
  0x6d   :  { %p998_p8 = pnand %p996_p7, %p993_p6 }
  0x6f   :  { %1001 = shalt.err (!%p998_p8)
}
  0x70   :  { %s1002_s0 = scalar_lea.vmem %s99_s16, 16  ;;  %s1006_s30 = scalar_lea.vmem %s99_s16, 32 }
  0x71   :  { %p1003_p9 = scmp.ne.s32.totalorder %s99_s16, %s1002_s0  ;;  %p1007_p10 = scmp.lt.s32.totalorder %s99_s16, %s99_s16 }
  0x72   :  { %p1008_p11 = scmp.lt.s32.totalorder %s1006_s30, %s1002_s0 }
  0x74   :  { %p1009_p12 = por %p1008_p11, %p1007_p10 }
  0x76   :  { %p1010_p13 = pnand %p1009_p12, %p1003_p9 }
  0x78   :  { %1013 = shalt.err (!%p1010_p13)
}
  0x79   :  { %101 = dma.hbm_to_vmem [thread:$0]  %s1404_s6, 16, %s99_s16, [#allocation12]  }
  0x7a   :  { %s1105_s1 = smov [#allocation14]   ;;  %s1014_s21 = scalar_lea.hbm %s1405_s7, 256 }
  0x7b   :  { %s107_s15 = sshll.u32 %s1105_s1, 4  ;;  %p1015_p0 = scmp.ne.s32.totalorder %s1405_s7, %s1014_s21  ;;  %s108_s15 = int_to_ptr.vmem [resolvable:$true] %s107_s15 }
  0x7c   :  { %p1018_p1 = scmp.lt.u32.totalorder %s1014_s21, %s1405_s7 }
  0x7e   :  { %p1020_p2 = pnand %p1018_p1, %p1015_p0 }
  0x80   :  { %1023 = shalt.err (!%p1020_p2)
}
  0x81   :  { %s1024_s2 = scalar_lea.vmem %s108_s15, 256  ;;  %p1029_p4 = scmp.lt.s32.totalorder %s108_s15, %s108_s15 }
  0x82   :  { %p1025_p3 = scmp.ne.s32.totalorder %s108_s15, %s1024_s2  ;;  %p1030_p5 = scmp.lt.s32.totalorder %s1024_s2, %s1024_s2 }
  0x84   :  { %p1031_p6 = por %p1030_p5, %p1029_p4 }
  0x86   :  { %p1032_p7 = pnand %p1031_p6, %p1025_p3 }
  0x88   :  { %1035 = shalt.err (!%p1032_p7)
}
  0x89   :  { %113 = dma.hbm_to_vmem [thread:$0]  %s1405_s7, 256, %s108_s15, [#allocation15], %s1095_s19, %s1095_s19, %s1096_s20  }
  0x8a   :  { %1080 = dma.done.wait [#allocation3], 256  }
  0x8b   :  { %1081 = vsyncadd [#allocation3], 4294967040 }
  0x8c   :  { %1082 = dma.done.wait [#allocation6], 768  }
  0x8d   :  { %1083 = vsyncadd [#allocation6], 4294966528 }
  0x8e   :  { %1084 = dma.done.wait [#allocation9], 272  }
  0x8f   :  { %1085 = vsyncadd [#allocation9], 4294967024 }
  0x90   :  { %1086 = dma.done.wait [#allocation12], 528  }
  0x91   :  { %1087 = vsyncadd [#allocation12], 4294966768 }
  0x92   :  { %1088 = dma.done.wait [#allocation15], 256  }
  0x93   :  { %1089 = vsyncadd [#allocation15], 4294967040  ;;  %v1106_v0 = vmov 1   ;;  %v1107_v1 = vmov 0   ;;  %v145_v2 = vld [vmem:[#allocation2] sm:$0xff]  ;;  %v146_v3 = vld [vmem:[#allocation2 + $0x8] sm:$0xff]  ;;  %v149_v39 = vlaneseq }
  0x94   :  { %810 = vset.pattern.permute.xlu1 %v1106_v0  ;;  %809 = vset.pattern.permute.xlu0 %v1107_v1  ;;  %v1108_v4 = vmov 0.0   ;;  %v1284_v5 = vld [vmem:[#allocation5] sm:$0xff]  ;;  %v1286_v6 = vld [vmem:[#allocation5 + $0x8] sm:$0xff]  ;;  %v1109_v7 = vmov 2   ;;  %v1110_v8 = vmov 3   ;;  %v1111_v9 = vmov 4  }
  0x95   :  { %178 = vperm.xlu1 %810, %v145_v2   ;;  %152 = vperm.xlu0 %809, %v145_v2   ;;  %v1112_v10 = vmov 5   ;;  %v1113_v11 = vmov 6   ;;  %v1114_v12 = vmov 7   ;;  %v826_v13 = vld [vmem:[#allocation7] sm:$0xff]   ;;  %v827_v14 = vld [vmem:[#allocation7 + $0x8] sm:$0xff]   ;;  %v828_v15 = vld [vmem:[#allocation7 + $0x10] sm:$0xff]  }
  0x96   :  { %751 = vmatprep.subr.bf16.mxu0 %v1108_v4  ;;  %763 = vmatprep.subr.bf16.mxu1 %v1108_v4  ;;  %v829_v16 = vld [vmem:[#allocation7 + $0x18] sm:$0xff]   ;;  %vm1115_vm0 = vmmov 0   ;;  %vm345_vm1 = vcmask 64512   ;;  %v1313_v41 = vand.u32 127, %v149_v39  ;;  %s1116_s7 = smov [#allocation17]  }
  0x97   :  { %752 = vmatpush3.bf16.msra.mxu0 %v826_v13  ;;  %759 = vmatprep.mubr.msk.bf16.mxu0 %vm1115_vm0, %v1108_v4  ;;  %v349_v17 = vsel %vm345_vm1, %v1286_v6, 0.0  ;;  %v346_v18 = vsel %vm345_vm1, %v1284_v5, 0.0  ;;  %s687_s10 = sshll.u32 %s1116_s7, 4  ;;  %s688_s10 = int_to_ptr.vmem [resolvable:$true] %s687_s10 }
  0x98   :  { %753 = vmatprep.subr.bf16.mxu0 %v1108_v4  ;;  %767 = vmatprep.mubr.msk.bf16.mxu1 %vm1115_vm0, %v1108_v4  ;;  %s1036_s14 = scalar_lea.vmem %s688_s10, 256  ;;  %p1041_p9 = scmp.lt.s32.totalorder %s688_s10, %s688_s10 }
  0x99   :  { %181 = vperm.xlu1 %810, %v146_v3   ;;  %155 = vperm.xlu0 %809, %v146_v3   ;;  %p1037_p8 = scmp.ne.s32.totalorder %s688_s10, %s1036_s14  ;;  %p1042_p10 = scmp.lt.s32.totalorder %s1036_s14, %s1036_s14 }
  0x9b   :  { %754 = vmatpush3.bf16.msra.mxu0 %v827_v14  ;;  %p1043_p11 = por %p1042_p10, %p1041_p9 }
  0x9c   :  { %755 = vmatprep.subr.bf16.mxu0 %v1108_v4 }
  0x9d   :  { %811 = vset.pattern.permute.xlu1 %v1107_v1  ;;  %165 = vperm.xlu0 %809, %v1284_v5   ;;  %p1044_p12 = pnand %p1043_p11, %p1037_p8 }
  0x9e   :  { %170 = vperm.xlu1 %811, %v1286_v6  }
  0x9f   :  { %756 = vmatpush3.bf16.msra.mxu0 %v828_v15 }
  0xa0   :  { %757 = vmatprep.subr.bf16.mxu0 %v1108_v4 }
  0xa1   :  { %812 = vset.pattern.permute.xlu0 %v1106_v0 }
  0xa2   :  { %813 = vset.pattern.permute.xlu1 %v1106_v0  ;;  %190 = vperm.xlu0 %812, %v1284_v5  }
  0xa3   :  { %194 = vperm.xlu1 %813, %v1286_v6   ;;  %758 = vmatpush3.bf16.msra.mxu0 %v829_v16 }
  0xa6   :  { %815 = vset.pattern.permute.xlu0 %v1109_v7 }
  0xa7   :  { %814 = vset.pattern.permute.xlu1 %v1109_v7  ;;  %205 = vperm.xlu0 %815, %v146_v3  }
  0xa8   :  { %202 = vperm.xlu1 %814, %v145_v2  }
  0xab   :  { %816 = vset.pattern.permute.xlu0 %v1110_v8 }
  0xac   :  { %214 = vperm.xlu1 %814, %v1284_v5   ;;  %226 = vperm.xlu0 %816, %v145_v2  }
  0xb0   :  { %218 = vperm.xlu1 %814, %v1286_v6   ;;  %242 = vperm.xlu0 %816, %v1286_v6  }
  0xb4   :  { %817 = vset.pattern.permute.xlu1 %v1110_v8  ;;  %819 = vset.pattern.permute.xlu0 %v1111_v9 }
  0xb5   :  { %229 = vperm.xlu1 %817, %v146_v3   ;;  %253 = vperm.xlu0 %819, %v146_v3  }
  0xb9   :  { %238 = vperm.xlu1 %817, %v1284_v5   ;;  %820 = vset.pattern.permute.xlu0 %v1112_v10 }
  0xba   :  { %274 = vperm.xlu0 %820, %v145_v2  }
  0xbd   :  { %818 = vset.pattern.permute.xlu1 %v1111_v9 }
  0xbe   :  { %250 = vperm.xlu1 %818, %v145_v2   ;;  %290 = vperm.xlu0 %820, %v1286_v6  }
  0xc2   :  { %262 = vperm.xlu1 %818, %v1284_v5   ;;  %823 = vset.pattern.permute.xlu0 %v1113_v11 }
  0xc3   :  { %301 = vperm.xlu0 %823, %v146_v3  }
  0xc6   :  { %266 = vperm.xlu1 %818, %v1286_v6  }
  0xc7   :  { %824 = vset.pattern.permute.xlu0 %v1114_v12 }
  0xc8   :  { %322 = vperm.xlu0 %824, %v145_v2  }
  0xca   :  { %821 = vset.pattern.permute.xlu1 %v1112_v10 }
  0xcb   :  { %277 = vperm.xlu1 %821, %v146_v3  }
  0xcc   :  { %338 = vperm.xlu0 %824, %v1286_v6  }
  0xcf   :  { %286 = vperm.xlu1 %821, %v1284_v5  }
  0xd3   :  { %822 = vset.pattern.permute.xlu1 %v1113_v11 }
  0xd4   :  { %298 = vperm.xlu1 %822, %v145_v2  }
  0xd8   :  { %310 = vperm.xlu1 %822, %v1284_v5  }
  0xdc   :  { %314 = vperm.xlu1 %822, %v1286_v6  }
  0xe0   :  { %825 = vset.pattern.permute.xlu1 %v1114_v12 }
  0xe1   :  { %325 = vperm.xlu1 %825, %v146_v3  }
  0xe5   :  { %334 = vperm.xlu1 %825, %v1284_v5  }
  0xeb   :  { %350 = vadd.xlane.f32.xlu0 %v349_v17 }
 0x109   :  { %347 = vadd.xlane.f32.xlu1 %v346_v18 }
 0x114   :  { %v179_v19 = vpop.permute.xlu1 %178  ;;  %v153_v22 = vpop.permute.xlu0 %152 }
 0x115   :  { %vm157_vm2 = vcmp.eq.s32.totalorder %v1313_v41, %v153_v22  ;;  %vm183_vm3 = vcmp.eq.s32.totalorder %v1313_v41, %v179_v19 }
 0x116   :  { %v707_v44 = vsel %vm157_vm2, 1.0, %v1108_v4  ;;  %v709_v45 = vsel %vm183_vm3, 1.0, %v1108_v4  ;;  %vm389_vm3 = vcmask 523264  }
 0x118   :  { %v182_v20 = vpop.permute.xlu1 %181  ;;  %v156_v24 = vpop.permute.xlu0 %155 }
 0x119   :  { %vm184_vm4 = vcmp.eq.s32.totalorder %v1313_v41, %v182_v20  ;;  %vm158_vm5 = vcmp.eq.s32.totalorder %v1313_v41, %v156_v24 }
 0x11a   :  { %v708_v47 = vsel %vm158_vm5, 1.0, %v1108_v4  ;;  %v710_v49 = vsel %vm184_vm4, 1.0, %v1108_v4  ;;  %vm460_vm4 = vcmask 261120  }
 0x11c   :  { %v166_v27 = vpop.permute.xlu0 %165 }
 0x11d   :  { %v171_v21 = vpop.permute.xlu1 %170  ;;  %v173_v48 = vmul.f32 %v707_v44, %v166_v27 }
 0x11e   :  { %v174_v54 = vmul.f32 %v708_v47, %v171_v21 }
 0x121   :  { %v191_v29 = vpop.permute.xlu0 %190 }
 0x122   :  { %v195_v23 = vpop.permute.xlu1 %194  ;;  %v197_v51 = vmul.f32 %v709_v45, %v191_v29 }
 0x123   :  { %v198_v53 = vmul.f32 %v710_v49, %v195_v23 }
 0x124   :  { %v199_v62 = vadd.f32 %v197_v51, %v173_v48 }
 0x125   :  { %v200_v63 = vadd.f32 %v198_v53, %v174_v54  ;;  %v832_v53 = vld [vmem:[#allocation11] sm:$0xff]   ;;  %v833_v54 = vld [vmem:[#allocation11 + $0x8] sm:$0xff]  }
 0x126   :  { %v206_v31 = vpop.permute.xlu0 %205 }
 0x127   :  { %v203_v25 = vpop.permute.xlu1 %202  ;;  %vm208_vm6 = vcmp.eq.s32.totalorder %v1313_v41, %v206_v31 }
 0x128   :  { %vm207_vm7 = vcmp.eq.s32.totalorder %v1313_v41, %v203_v25  ;;  %v712_v52 = vsel %vm208_vm6, 1.0, %v1108_v4 }
 0x129   :  { %v711_v55 = vsel %vm207_vm7, 1.0, %v1108_v4  ;;  %vm143_vm7 = vcmask 0  }
 0x12a   :  { %144 = vst.msk [vmem:[#allocation16] sm:$0x1] %vm143_vm7, %v1108_v4 }
 0x12b   :  { %v215_v26 = vpop.permute.xlu1 %214  ;;  %v227_v33 = vpop.permute.xlu0 %226 }
 0x12c   :  { %vm231_vm8 = vcmp.eq.s32.totalorder %v1313_v41, %v227_v33  ;;  %v221_v57 = vmul.f32 %v711_v55, %v215_v26  ;;  %v834_v55 = vld [vmem:[#allocation11 + $0x10] sm:$0xff]  }
 0x12d   :  { %v713_v60 = vsel %vm231_vm8, 1.0, %v1108_v4  ;;  %vm669_vm8 = vcmask 7168  }
 0x12e   :  { %v223_v3 = vadd.f32 %v221_v57, %v199_v62  ;;  %v728_v57 = vld [vmem:[#allocation10] ss:$0 sm:$0xff] }
 0x12f   :  { %v219_v28 = vpop.permute.xlu1 %218  ;;  %v243_v36 = vpop.permute.xlu0 %242 }
 0x130   :  { %v222_v58 = vmul.f32 %v712_v52, %v219_v28 }
 0x132   :  { %v224_v5 = vadd.f32 %v222_v58, %v200_v63 }
 0x134   :  { %v230_v30 = vpop.permute.xlu1 %229  ;;  %v254_v38 = vpop.permute.xlu0 %253 }
 0x135   :  { %vm232_vm9 = vcmp.eq.s32.totalorder %v1313_v41, %v230_v30  ;;  %vm256_vm10 = vcmp.eq.s32.totalorder %v1313_v41, %v254_v38  ;;  %v831_v38 = vld [vmem:[#allocation8 + $0x8] sm:$0xff]  }
 0x136   :  { %v714_v59 = vsel %vm232_vm9, 1.0, %v1108_v4  ;;  %v716_v0 = vsel %vm256_vm10, 1.0, %v1108_v4 }
 0x137   :  { %v246_v1 = vmul.f32 %v714_v59, %v243_v36 }
 0x138   :  { %v239_v32 = vpop.permute.xlu1 %238 }
 0x139   :  { %v275_v42 = vpop.permute.xlu0 %274  ;;  %v245_v2 = vmul.f32 %v713_v60, %v239_v32  ;;  %v248_v13 = vadd.f32 %v246_v1, %v224_v5 }
 0x13a   :  { %vm279_vm12 = vcmp.eq.s32.totalorder %v1313_v41, %v275_v42 }
 0x13b   :  { %v717_v11 = vsel %vm279_vm12, 1.0, %v1108_v4  ;;  %v247_v14 = vadd.f32 %v245_v2, %v223_v3  ;;  %v732_v3 = vld [vmem:[#allocation13] ss:$0 sm:$0xff] }
 0x13d   :  { %v251_v34 = vpop.permute.xlu1 %250  ;;  %v291_v46 = vpop.permute.xlu0 %290 }
 0x13e   :  { %vm255_vm11 = vcmp.eq.s32.totalorder %v1313_v41, %v251_v34 }
 0x13f   :  { %v715_v6 = vsel %vm255_vm11, 1.0, %v1108_v4 }
 0x141   :  { %v263_v35 = vpop.permute.xlu1 %262 }
 0x142   :  { %v302_v56 = vpop.permute.xlu0 %301  ;;  %v269_v8 = vmul.f32 %v715_v6, %v263_v35 }
 0x143   :  { %vm304_vm14 = vcmp.eq.s32.totalorder %v1313_v41, %v302_v56  ;;  %v835_v56 = vld [vmem:[#allocation11 + $0x18] sm:$0xff]  }
 0x144   :  { %v720_v15 = vsel %vm304_vm14, 1.0, %v1108_v4  ;;  %v271_v18 = vadd.f32 %v269_v8, %v247_v14 }
 0x145   :  { %v267_v37 = vpop.permute.xlu1 %266 }
 0x146   :  { %v270_v9 = vmul.f32 %v716_v0, %v267_v37  ;;  %v830_v37 = vld [vmem:[#allocation8] sm:$0xff]  }
 0x147   :  { %v323_v12 = vpop.permute.xlu0 %322  ;;  %764 = vmatpush3.bf16.msra.mxu1 %v830_v37 }
 0x148   :  { %v272_v19 = vadd.f32 %v270_v9, %v248_v13  ;;  %vm327_vm1 = vcmp.eq.s32.totalorder %v1313_v41, %v323_v12  ;;  %765 = vmatprep.subr.bf16.mxu1 %v1108_v4 }
 0x149   :  { %v721_v30 = vsel %vm327_vm1, 1.0, %v1108_v4 }
 0x14a   :  { %v278_v40 = vpop.permute.xlu1 %277 }
 0x14b   :  { %vm280_vm13 = vcmp.eq.s32.totalorder %v1313_v41, %v278_v40  ;;  %v339_v25 = vpop.permute.xlu0 %338  ;;  %766 = vmatpush3.bf16.msra.mxu1 %v831_v38 }
 0x14c   :  { %v718_v10 = vsel %vm280_vm13, 1.0, %v1108_v4  ;;  %771 = vmatprep.subr.bf16.mxu1 %v1108_v4 }
 0x14d   :  { %v294_v16 = vmul.f32 %v718_v10, %v291_v46 }
 0x14e   :  { %v287_v43 = vpop.permute.xlu1 %286 }
 0x14f   :  { %v293_v17 = vmul.f32 %v717_v11, %v287_v43  ;;  %v296_v26 = vadd.f32 %v294_v16, %v272_v19 }
 0x151   :  { %v295_v27 = vadd.f32 %v293_v17, %v271_v18 }
 0x153   :  { %v299_v50 = vpop.permute.xlu1 %298 }
 0x154   :  { %vm303_vm15 = vcmp.eq.s32.totalorder %v1313_v41, %v299_v50 }
 0x155   :  { %v719_v20 = vsel %vm303_vm15, 1.0, %v1108_v4 }
 0x157   :  { %v311_v61 = vpop.permute.xlu1 %310 }
 0x158   :  { %v317_v22 = vmul.f32 %v719_v20, %v311_v61 }
 0x15a   :  { %v319_v31 = vadd.f32 %v317_v22, %v295_v27 }
 0x15b   :  { %v315_v7 = vpop.permute.xlu1 %314 }
 0x15c   :  { %v318_v23 = vmul.f32 %v720_v15, %v315_v7 }
 0x15e   :  { %v320_v32 = vadd.f32 %v318_v23, %v296_v26  ;;  %v592_v23 = vld [vmem:[#allocation14] sm:$0xff] }
 0x160   :  { %v326_v21 = vpop.permute.xlu1 %325 }
 0x161   :  { %vm328_vm2 = vcmp.eq.s32.totalorder %v1313_v41, %v326_v21 }
 0x162   :  { %v722_v24 = vsel %vm328_vm2, 1.0, %v1108_v4 }
 0x163   :  { %v342_v28 = vmul.f32 %v722_v24, %v339_v25  ;;  %v593_v25 = vld [vmem:[#allocation14 + $0x8] sm:$0xff] }
 0x164   :  { %v335_v29 = vpop.permute.xlu1 %334 }
 0x165   :  { %v341_v33 = vmul.f32 %v721_v30, %v335_v29  ;;  %v344_v34 = vadd.f32 %v342_v28, %v320_v32 }
 0x167   :  { %v343_v35 = vadd.f32 %v341_v33, %v319_v31 }
 0x169   :  { %v356_v36 = vpack.c.bf16 %v344_v34, %v343_v35 }
 0x16b   :  { %760 = vmatmul.mubr.msk.bf16.vlgmr.msra.gmra.mrb[0].mxu0 %vm389_vm3, %v356_v36 }
 0x178   :  { %v351_v39 = vpop.xlane.xlu0 %350 }
 0x179   :  { %v353_v42 = vmax.f32 %v351_v39, 1.0 }
 0x17b   :  { %836 = vrcp.f32 %v353_v42 }
 0x185   :  { %v837_v44 = vpop.eup %836 }
 0x196   :  { %v348_v40 = vpop.xlane.xlu1 %347 }
 0x197   :  { %v352_v43 = vmax.f32 %v348_v40, 1.0 }
 0x199   :  { %838 = vrcp.f32 %v352_v43 }
 0x1a3   :  { %v839_v45 = vpop.eup %838 }
 0x23e   :  { %v427_v46 = vpop.f32.mrb[0].mxu0 }
 0x23f   :  { %v761_v47 = vpop.f32.mrb[1].mxu0  ;;  %v434_v49 = vmul.f32 %v839_v45, %v427_v46 }
 0x240   :  { %v430_v48 = vpop.f32.mrb[2].mxu0 }
 0x241   :  { %v435_v50 = vmul.f32 %v837_v44, %v430_v48  ;;  %v762_v51 = vpop.f32.mrb[3].mxu0 }
 0x243   :  { %v436_v52 = vpack.c.bf16 %v435_v50, %v434_v49 }
 0x245   :  { %768 = vmatmul.mubr.msk.bf16.vlgmr.msra.gmra.mrb[0].mxu1 %vm460_vm4, %v436_v52 }
 0x246   :  { %779 = vmatprep.mubr.msk.bf16.mxu1 %vm1115_vm0, %v1108_v4  ;;  %772 = vmatpush3.bf16.msra.mxu1 %v832_v53  ;;  %vm591_vm0 = vcmp.lt.s32.totalorder %v1313_v41, 2 }
 0x247   :  { %773 = vmatprep.subr.bf16.mxu1 %v1108_v4 }
 0x24a   :  { %774 = vmatpush3.bf16.msra.mxu1 %v833_v54 }
 0x24b   :  { %775 = vmatprep.subr.bf16.mxu1 %v1108_v4 }
 0x24e   :  { %776 = vmatpush3.bf16.msra.mxu1 %v834_v55 }
 0x24f   :  { %777 = vmatprep.subr.bf16.mxu1 %v1108_v4 }
 0x252   :  { %778 = vmatpush3.bf16.msra.mxu1 %v835_v56 }
 0x318   :  { %v498_v58 = vpop.f32.mrb[0].mxu1 }
 0x319   :  { %v499_v59 = vadd.f32 %v728_v57, %v498_v58  ;;  %v769_v60 = vpop.f32.mrb[1].mxu1 }
 0x31a   :  { %v501_v61 = vpop.f32.mrb[2].mxu1 }
 0x31b   :  { %v502_v62 = vadd.f32 %v728_v57, %v501_v61  ;;  %v770_v63 = vpop.f32.mrb[3].mxu1  ;;  %840 = vtanh.f32 %v499_v59 }
 0x31d   :  { %842 = vtanh.f32 %v502_v62 }
 0x325   :  { %v841_v0 = vpop.eup %840 }
 0x327   :  { %v843_v1 = vpop.eup %842 }
 0x328   :  { %v507_v2 = vpack.c.bf16 %v843_v1, %v841_v0 }
 0x32a   :  { %780 = vmatmul.mubr.msk.bf16.vlgmr.msra.gmra.mrb[4].mxu1 %vm389_vm3, %v507_v2 }
 0x3fd   :  { %v584_v5 = vpop.f32.mrb[4].mxu1 }
 0x3fe   :  { %v585_v6 = vadd.f32 %v732_v3, %v584_v5  ;;  %v781_v7 = vpop.f32.mrb[5].mxu1 }
 0x3ff   :  { %v587_v8 = vpop.f32.mrb[6].mxu1 }
 0x400   :  { %v600_v9 = vand.u32 2147483647, %v585_v6  ;;  %v588_v10 = vadd.f32 %v732_v3, %v587_v8  ;;  %v782_v11 = vpop.f32.mrb[7].mxu1  ;;  %v651_v12 = vsel %vm591_vm0, %v585_v6, 0.0  ;;  %v594_v27 = vmax.f32 %v585_v6, 0.0 }
 0x401   :  { %653 = vadd.xlane.f32.xlu1 %v651_v12  ;;  %v596_v28 = vmul.f32 %v592_v23, %v585_v6 }
 0x402   :  { %v602_v13 = vsub.f32 0.0, %v600_v9  ;;  %v601_v14 = vand.u32 2147483647, %v588_v10  ;;  %v595_v32 = vmax.f32 %v588_v10, 0.0  ;;  %v597_v33 = vmul.f32 %v593_v25, %v588_v10 }
 0x403   :  { %v598_v38 = vsub.f32 %v594_v27, %v596_v28  ;;  %v652_v50 = vsel %vm591_vm0, %v588_v10, 0.0 }
 0x404   :  { %v604_v15 = vmul.f32 1.442695, %v602_v13  ;;  %v603_v16 = vsub.f32 0.0, %v601_v14  ;;  %v599_v43 = vsub.f32 %v595_v32, %v597_v33 }
 0x406   :  { %844 = vpow2.f32 %v604_v15  ;;  %v606_v17 = vmul.f32 1.442695, %v603_v16 }
 0x408   :  { %846 = vpow2.f32 %v606_v17 }
 0x410   :  { %v845_v18 = vpop.eup %844 }
 0x411   :  { %v608_v19 = vadd.f32 1.0, %v845_v18  ;;  %v611_v22 = vmul.f32 -0.5, %v845_v18  ;;  %v614_v29 = vand.u32 2147483647, %v845_v18 }
 0x412   :  { %v847_v20 = vpop.eup %846 }
 0x413   :  { %848 = vlog2.f32 %v608_v19  ;;  %v617_v21 = vadd.f32 1.0, %v847_v20  ;;  %v620_v24 = vmul.f32 -0.5, %v847_v20  ;;  %v612_v26 = vadd.f32 1.0, %v611_v22 }
 0x414   :  { %v623_v34 = vand.u32 2147483647, %v847_v20  ;;  %vm615_vm5 = vcmp.lt.f32.partialorder %v614_v29, 0.0004427343 }
 0x415   :  { %850 = vlog2.f32 %v617_v21  ;;  %v621_v30 = vadd.f32 1.0, %v620_v24  ;;  %v613_v36 = vmul.f32 %v845_v18, %v612_v26 }
 0x416   :  { %vm624_vm6 = vcmp.lt.f32.partialorder %v623_v34, 0.0004427343 }
 0x417   :  { %v622_v42 = vmul.f32 %v847_v20, %v621_v30 }
 0x41d   :  { %v849_v31 = vpop.eup %848 }
 0x41e   :  { %v610_v35 = vmul.f32 0.6931472, %v849_v31 }
 0x41f   :  { %v851_v37 = vpop.eup %850 }
 0x420   :  { %v616_v39 = vsel %vm615_vm5, %v613_v36, %v610_v35  ;;  %v619_v40 = vmul.f32 0.6931472, %v851_v37 }
 0x421   :  { %v626_v44 = vadd.f32 %v616_v39, %v598_v38 }
 0x422   :  { %v625_v45 = vsel %vm624_vm6, %v622_v42, %v619_v40 }
 0x423   :  { %v627_v46 = vadd.f32 %v625_v45, %v599_v43  ;;  %v629_v47 = vsel %vm591_vm0, %v626_v44, 0.0 }
 0x425   :  { %v630_v48 = vsel %vm591_vm0, %v627_v46, 0.0 }
 0x426   :  { %v631_v49 = vadd.f32 %v630_v48, %v629_v47 }
 0x428   :  { %632 = vadd.xlane.f32.xlu0 %v631_v49 }
 0x42c   :  { %655 = vadd.xlane.f32.xlu0 %v652_v50 }
 0x48e   :  { %v654_v51 = vpop.xlane.xlu1 %653 }
 0x48f   :  { %v657_v52 = vmul.f32 0.5, %v654_v51 }
 0x491   :  { %v659_v53 = vsub.f32 0.0, %v657_v52 }
 0x493   :  { %v661_v54 = vmul.f32 1.442695, %v659_v53 }
 0x495   :  { %852 = vpow2.f32 %v661_v54 }
 0x49f   :  { %v853_v55 = vpop.eup %852 }
 0x4a0   :  { %v665_v56 = vadd.f32 1.0, %v853_v55 }
 0x4a2   :  { %854 = vrcp.f32 %v665_v56 }
 0x4ac   :  { %v855_v57 = vpop.eup %854 }
 0x4ad   :  { %670 = vst.msk [vmem:[#allocation17] sm:$0xff] %vm669_vm8, %v855_v57 }
 0x4b5   :  { %v633_v58 = vpop.xlane.xlu0 %632 }
 0x4b6   :  { %v634_v41 = vrot.slane %v633_v58, 4 }
 0x4b8   :  { %v635_v59 = vadd.f32 %v634_v41, %v633_v58 }
 0x4b9   :  { %v656_v60 = vpop.xlane.xlu0 %655 }
 0x4ba   :  { %v636_v61 = vrot.slane %v635_v59, 2  ;;  %v658_v62 = vmul.f32 0.5, %v656_v60 }
 0x4bc   :  { %v660_v63 = vsub.f32 0.0, %v658_v62  ;;  %v637_v4 = vadd.f32 %v636_v61, %v635_v59 }
 0x4be   :  { %v663_v0 = vmul.f32 1.442695, %v660_v63  ;;  %v638_v1 = vrot.slane %v637_v4, 1 }
 0x4c0   :  { %856 = vpow2.f32 %v663_v0  ;;  %v639_v2 = vadd.f32 %v638_v1, %v637_v4 }
 0x4c2   :  { %783 = vpush %v639_v2 }
 0x4ca   :  { %v857_v3 = vpop.eup %856 }
 0x4cb   :  { %v666_v5 = vadd.f32 1.0, %v857_v3 }
 0x4cd   :  { %858 = vrcp.f32 %v666_v5 }
 0x4d7   :  { %v859_v6 = vpop.eup %858 }
 0x4d8   :  { %671 = vst.msk [vmem:[#allocation17 + $0x8] sm:$0xff] %vm669_vm8, %v859_v6 }
 0x4d9   :  { %1047 = shalt.err (!%p1044_p12)
}
 0x4da   :  { %s1048_s27 = scalar_lea.hbm %s1407_s9, 256 }
 0x4db   :  { %p1049_p13 = scmp.ne.s32.totalorder %s1407_s9, %s1048_s27  ;;  %p1052_p0 = scmp.lt.u32.totalorder %s1048_s27, %s1407_s9 }
 0x4dd   :  { %p1054_p1 = pnand %p1052_p0, %p1049_p13 }
 0x4df   :  { %1057 = shalt.err (!%p1054_p1)
}
 0x4e0   :  { %693 = dma.vmem_to_hbm [thread:$0]  %s688_s10, 256, %s1407_s9, [#allocation18], %s1095_s19, %s1095_s19, %s1096_s20   ;;  %v628_v7 = vld [vmem:[#allocation16] sm:$0x1] }
 0x4e1   :  { %s1117_s4 = smov [#allocation16]  }
 0x4e2   :  { %s678_s13 = sshll.u32 %s1117_s4, 4  ;;  %s679_s13 = int_to_ptr.vmem [resolvable:$true] %s678_s13 }
 0x4e3   :  { %s1058_s1 = scalar_lea.vmem %s679_s13, 16  ;;  %s1062_s15 = scalar_lea.vmem %s679_s13, 32 }
 0x4e4   :  { %p1059_p2 = scmp.ne.s32.totalorder %s679_s13, %s1058_s1  ;;  %p1063_p3 = scmp.lt.s32.totalorder %s679_s13, %s679_s13 }
 0x4e5   :  { %p1064_p4 = scmp.lt.s32.totalorder %s1062_s15, %s1058_s1 }
 0x4e7   :  { %p1065_p5 = por %p1064_p4, %p1063_p3 }
 0x4e9   :  { %p1066_p6 = pnand %p1065_p5, %p1059_p2 }
 0x4f3   :  { %s784_s30 = spop %783 }
 0x4f4   :  { %v641_v8 = vstv %s784_s30 }
 0x4f5   :  { %v642_v9 = vadd.f32 %v641_v8, %v628_v7 }
 0x4f7   :  { %644 = vst.msk [vmem:[#allocation16] sm:$0x1] %vm143_vm7, %v642_v9 }
 0x4fe   :  { %v648_v10 = vld [vmem:[#allocation16] sm:$0x1] }
 0x4ff   :  { %v649_v11 = vmul.f32 0.03125, %v648_v10 }
 0x501   :  { %650 = vst.msk [vmem:[#allocation16] sm:$0x1] %vm143_vm7, %v649_v11 }
 0x502   :  { %1069 = shalt.err (!%p1066_p6)
}
 0x503   :  { %s1070_s20 = scalar_lea.hbm %s1406_s8, 16 }
 0x504   :  { %p1071_p7 = scmp.ne.s32.totalorder %s1406_s8, %s1070_s20  ;;  %p1074_p8 = scmp.lt.u32.totalorder %s1070_s20, %s1406_s8 }
 0x506   :  { %p1076_p9 = pnand %p1074_p8, %p1071_p7 }
 0x508   :  { %1079 = shalt.err (!%p1076_p9)
}
 0x509   :  { %681 = dma.vmem_to_hbm [thread:$0]  %s679_s13, 16, %s1406_s8, [#allocation4]  }
 0x50a   :  { %1090 = dma.done.wait [#allocation4], 16  }
 0x50b   :  { %1091 = vsyncadd [#allocation4], 4294967280 }
 0x50c   :  { %1092 = dma.done.wait [#allocation18], 256  }
 0x50d   :  { %1093 = vsyncadd [#allocation18], 4294967040 }
 0x50e   :  { %700 = vsyncpa [#allocation3], 1 }
 0x50f   :  { %701 = vsyncpa [#allocation6], 1 }
 0x510   :  { %702 = vsyncpa [#allocation9], 1 }
 0x511   :  { %703 = vsyncpa [#allocation12], 1 }
 0x512   :  { %704 = vsyncpa [#allocation15], 1 }
 0x513   :  { %705 = vsyncpa [#allocation4], 1 }
 0x514   :  { %706 = vsyncpa [#allocation18], 1 }

</bundles_post_ra>
